<compile_context>
chip_gen: v5e
topology: v5e:2x2
jax: 0.10.0
libtpu: 0.0.40
codegen_flags: <defaults>
</compile_context>

<pallas_src>
import jax
import jax.numpy as jnp
from jax.experimental import pallas as pl
from jax.experimental.pallas import tpu as pltpu


# ---------------------------------------------------------------------------
# Kernel body
# ---------------------------------------------------------------------------
def _lognormal_kernel(mu_ref, log_sigma_ref, x_ref, o_ref):
    # Scalar prelude: SMEM scalars, computed once per grid step in f32
    # (matches PyTorch's f32 parameter math even if x is bf16).
    mu = mu_ref[0].astype(jnp.float32)
    log_sigma = log_sigma_ref[0].astype(jnp.float32)
    neg_log_sigma = -log_sigma                        # == log(1/sigma)
    half_inv_var = 0.5 * jnp.exp(-2.0 * log_sigma)    # == 0.5 / sigma**2

    # Per-element vector math: sub, mul, mul, sub (well under VALU roofline).
    d = x_ref[...].astype(jnp.float32) - mu
    o_ref[...] = (neg_log_sigma - d * d * half_inv_var).astype(o_ref.dtype)


# ---------------------------------------------------------------------------
# Helpers
# ---------------------------------------------------------------------------
def _vmem_capacity_bytes():
    """Physical VMEM per core; conservative default if unavailable."""
    try:
        cap = int(getattr(pltpu.get_tpu_info(), "vmem_capacity_bytes", 0))
        if cap > 0:
            return cap
    except Exception:
        pass
    return 64 << 20  # assume the smallest (v7x per-TensorCore)


def _pick_lane(total, max_lane=1024):
    """Largest power-of-two lane width (multiple of 128) dividing `total`."""
    lane = max_lane
    while lane >= 128:
        if total % lane == 0:
            return lane
        lane //= 2
    return None


def _lognormal_jnp(x_flat, mu, log_sigma):
    """Fused elementwise fallback for tiny tails (kept off the hot path)."""
    ls = log_sigma[0].astype(jnp.float32)
    m = mu[0].astype(jnp.float32)
    d = x_flat.astype(jnp.float32) - m
    return (-ls - d * d * (0.5 * jnp.exp(-2.0 * ls))).astype(x_flat.dtype)


def _lognormal_pallas_2d(x_flat, mu, log_sigma, total, lane, donate_x):
    """Run the kernel over a LANE-divisible flat slab; returns flat output."""
    dtype = x_flat.dtype
    itemsize = jnp.dtype(dtype).itemsize
    rows = total // lane
    x2d = x_flat.reshape(rows, lane)

    # Generation-aware block sizing (per-buffer bytes).
    vmem_cap = _vmem_capacity_bytes()
    block_bytes = (8 << 20) if vmem_cap >= (96 << 20) else (6 << 20)
    block_rows = max(8, (block_bytes // (lane * itemsize)) // 8 * 8)

    if rows <= block_rows:
        if rows >= 16:
            # Force >= 2 grid steps so dual-TensorCore chips (v7x) split the
            # streaming work across both cores.
            half = -(-rows // 2)
            block_rows = ((half + 7) // 8) * 8
        else:
            # Tiny input: single block covering the whole array
            # (block dim == full dim, so (8,128) divisibility is waived).
            block_rows = rows

    grid = (pl.cdiv(rows, block_rows),)

    # 2 double-buffered arrays (in + out) + headroom, set explicitly so the
    # default scoped-VMEM limit (16 MiB on v5e) never bites.
    vmem_limit = 4 * block_bytes + (8 << 20)

    cost = pl.CostEstimate(
        flops=4 * total,
        transcendentals=int(grid[0]),          # one scalar exp per grid step
        bytes_accessed=2 * total * itemsize,   # read x, write out
    )

    extra = {}
    if donate_x:
        # Reuse x's HBM buffer for the output (only beneficial if the caller
        # actually donates x; otherwise XLA inserts a defensive copy).
        extra["input_output_aliases"] = {2: 0}

    out2d = pl.pallas_call(
        _lognormal_kernel,
        out_shape=jax.ShapeDtypeStruct((rows, lane), dtype),
        grid_spec=pltpu.PrefetchScalarGridSpec(
            num_scalar_prefetch=0,
            grid=grid,
            in_specs=[
                pl.BlockSpec(memory_space=pltpu.SMEM),   # mu (1,)
                pl.BlockSpec(memory_space=pltpu.SMEM),   # log_sigma (1,)
                pl.BlockSpec((block_rows, lane), lambda i: (i, 0)),
            ],
            out_specs=pl.BlockSpec((block_rows, lane), lambda i: (i, 0)),
        ),
        compiler_params=pltpu.CompilerParams(
            dimension_semantics=("parallel",),
            vmem_limit_bytes=int(vmem_limit),
        ),
        cost_estimate=cost,
        **extra,
    )(mu, log_sigma, x2d)

    return out2d.reshape(-1)


# ---------------------------------------------------------------------------
# Public wrapper (forward pass of LogNormalFunc)
# ---------------------------------------------------------------------------
def lognormal_func(x, mu, log_sigma, *, donate_x=False):
    """x: arbitrary-shape float array; mu, log_sigma: shape-(1,) params."""
    orig_shape = x.shape
    total = int(x.size)
    if total == 0:
        return x

    x_flat = x.reshape(-1)  # contiguous reshape: free

    lane = _pick_lane(total)
    if lane is not None:
        # Fast path: zero extra HBM passes (no pad, no slice).
        out_flat = _lognormal_pallas_2d(x_flat, mu, log_sigma, total, lane,
                                        donate_x)
    else:
        # Ragged total (not a multiple of 128): kernel on the 128-divisible
        # bulk, tiny fused jnp expression for the <128-element tail.  This
        # replaces the old full-array jnp.pad / prefix-slice round trips.
        bulk = (total // 128) * 128
        if bulk == 0:
            out_flat = _lognormal_jnp(x_flat, mu, log_sigma)
        else:
            lane_b = _pick_lane(bulk)
            out_bulk = _lognormal_pallas_2d(x_flat[:bulk], mu, log_sigma,
                                            bulk, lane_b, False)
            out_tail = _lognormal_jnp(x_flat[bulk:], mu, log_sigma)
            out_flat = jnp.concatenate([out_bulk, out_tail])

    return out_flat.reshape(orig_shape)


# ---------------------------------------------------------------------------
# Reference + self-test
# ---------------------------------------------------------------------------
def _reference(x, mu, log_sigma):
    sigma = jnp.exp(log_sigma)
    return jnp.log(1.0 / sigma) - 0.5 * ((x - mu[0]) / sigma) ** 2


if __name__ == "__main__":
    key = jax.random.PRNGKey(0)

    # Primary example: NCHW-shaped input, parameters as initialized by the
    # PyTorch module (nn.Parameter(t.tensor([0.0]))).
    x = jax.random.normal(key, (2, 4, 16, 16), dtype=jnp.float32)
    mu = jnp.array([0.0], dtype=jnp.float32)
    log_sigma = jnp.array([0.0], dtype=jnp.float32)

    out = lognormal_func(x, mu, log_sigma)
    jax.block_until_ready(out)
    ref = _reference(x, mu, log_sigma)
    assert out.shape == x.shape
    assert jnp.allclose(out, ref, atol=1e-6, rtol=1e-6)

    # Secondary check: non-trivial params + ragged size (bulk kernel + jnp
    # tail, exercises the partial-row-block masking path too).
    k1, k2 = jax.random.split(key)
    x_odd = jax.random.normal(k1, (3, 5, 33, 17), dtype=jnp.float32)
    mu2 = jnp.array([0.7], dtype=jnp.float32)
    ls2 = jnp.array([0.3], dtype=jnp.float32)
    out_odd = lognormal_func(x_odd, mu2, ls2)
    jax.block_until_ready(out_odd)
    assert jnp.allclose(out_odd, _reference(x_odd, mu2, ls2), atol=1e-5, rtol=1e-5)

    # Larger input to exercise the multi-step pipelined path (grid >= 2).
    x_big = jax.random.normal(k2, (16, 16, 64, 64), dtype=jnp.float32)
    out_big = lognormal_func(x_big, mu2, ls2)
    jax.block_until_ready(out_big)
    assert jnp.allclose(out_big, _reference(x_big, mu2, ls2), atol=1e-5, rtol=1e-5)

    print("KERNEL_OK")
</pallas_src>

<mosaic_0001>
module attributes {stable_mosaic.version = 11 : i64} {
  func.func @_lognormal_kernel(%arg0: i32, %arg1: memref<1xf32, #tpu.memory_space<smem>>, %arg2: memref<1xf32, #tpu.memory_space<smem>>, %arg3: memref<2x1024xf32, #tpu.memory_space<vmem>>, %arg4: memref<2x1024xf32, #tpu.memory_space<vmem>>) attributes {dimension_semantics = [#tpu.dimension_semantics<parallel>], iteration_bounds = array<i64: 1>, scalar_prefetch = 0 : i64, scratch_operands = 0 : i64, tpu.core_type = #tpu.core_type<tc>, window_params = [{transform_indices = @transform_0, window_bounds = array<i64: 1>}, {transform_indices = @transform_1, window_bounds = array<i64: 1>}, {transform_indices = @transform_2, window_bounds = array<i64: 2, 1024>}, {transform_indices = @transform_3, window_bounds = array<i64: 2, 1024>}]} {
    %c0 = arith.constant 0 : index
    %0 = memref.load %arg1[%c0] : memref<1xf32, #tpu.memory_space<smem>>
    %c0_0 = arith.constant 0 : index
    %1 = memref.load %arg2[%c0_0] : memref<1xf32, #tpu.memory_space<smem>>
    %cst = arith.constant 0.000000e+00 : f32
    %2 = arith.subf %cst, %1 : f32
    %cst_1 = arith.constant -2.000000e+00 : f32
    %3 = arith.mulf %cst_1, %1 : f32
    %4 = math.exp %3 : f32
    %cst_2 = arith.constant 5.000000e-01 : f32
    %5 = arith.mulf %cst_2, %4 : f32
    %c0_3 = arith.constant 0 : index
    %c0_4 = arith.constant 0 : index
    %6 = vector.load %arg3[%c0_3, %c0_4] : memref<2x1024xf32, #tpu.memory_space<vmem>>, vector<2x1024xf32>
    %7 = vector.broadcast %0 : f32 to vector<2x1024xf32>
    %8 = arith.subf %6, %7 : vector<2x1024xf32>
    %9 = arith.mulf %8, %8 : vector<2x1024xf32>
    %10 = vector.broadcast %5 : f32 to vector<2x1024xf32>
    %11 = arith.mulf %9, %10 : vector<2x1024xf32>
    %12 = vector.broadcast %2 : f32 to vector<2x1024xf32>
    %13 = arith.subf %12, %11 : vector<2x1024xf32>
    %c0_5 = arith.constant 0 : index
    %c0_6 = arith.constant 0 : index
    %14 = vector.load %arg4[%c0_5, %c0_6] : memref<2x1024xf32, #tpu.memory_space<vmem>>, vector<2x1024xf32>
    tpu.vector_store %arg4[%c0_5, %c0_6], %13 {strides = array<i32>} : memref<2x1024xf32, #tpu.memory_space<vmem>>, vector<2x1024xf32>,
    return
  }
  func.func @transform_0(%arg0: i32) -> i32 {
    %c0_i32 = arith.constant 0 : i32
    %c0_i32_0 = arith.constant 0 : i32
    return %c0_i32 : i32
  }
  func.func @transform_1(%arg0: i32) -> i32 {
    %c0_i32 = arith.constant 0 : i32
    %c0_i32_0 = arith.constant 0 : i32
    return %c0_i32 : i32
  }
  func.func @transform_2(%arg0: i32) -> (i32, i32) {
    %c0_i32 = arith.constant 0 : i32
    %c0_i32_0 = arith.constant 0 : i32
    return %arg0, %c0_i32 : i32, i32
  }
  func.func @transform_3(%arg0: i32) -> (i32, i32) {
    %c0_i32 = arith.constant 0 : i32
    %c0_i32_0 = arith.constant 0 : i32
    return %arg0, %c0_i32 : i32, i32
  }
}

</mosaic_0001>

<bundles_post_ra>
// kernel: tpu_custom_call.1
= control target key start
LH: loop header
LB: loop body
LE: loop exit
PB: predicated region body
PF: predicated region fallthrough
CT: control target
= control target key end

     0   :  { %10 = vsyncpa [#allocation5], 0  ;;  %s167_s0 = inlined_call_operand.<no memory space> [shape: f32[1], index: 0, kind: input, shape index: {}]   ;;  %s168_s1 = inlined_call_operand.<no memory space> [shape: f32[1], index: 1, kind: input, shape index: {}]   ;;  %s169_s2 = inlined_call_operand.hbm [shape: f32[2,1024], index: 2, kind: input, shape index: {}]   ;;  %s170_s3 = inlined_call_operand.hbm [shape: f32[2,1024], index: 3, kind: output, shape index: {}]  }
   0x1   :  { %11 = vsyncpa [#allocation6], 0  ;;  %s21_s14 = sshll.u32 %s169_s2, 4  ;;  %s130_s15 = smov [#allocation4]   ;;  %s22_s14 = int_to_ptr.hbm [resolvable:$true] %s21_s14 }
   0x2   :  { %s23_s16 = sshll.u32 %s130_s15, 4  ;;  %s34_s19 = smul.f32 -2.0, %s168_s1  ;;  %s24_s16 = int_to_ptr.vmem [resolvable:$true] %s23_s16 }
   0x3   :  { %26 = dma.hbm_to_vmem [thread:$0]  %s22_s14, 256, %s24_s16, [#allocation5]  }
   0x4   :  { %126 = dma.done.wait [#allocation5], 256  }
   0x5   :  { %127 = vsyncadd [#allocation5], 4294967040  ;;  %v35_v0 = vstv %s34_s19  ;;  %v40_v3 = vld [vmem:[#allocation4] sm:$0xff]  ;;  %v41_v4 = vld [vmem:[#allocation4 + $0x8] sm:$0xff]  ;;  %v42_v5 = vstv %s167_s0  ;;  %s33_s23 = ssub.f32 0.0, %s168_s1  ;;  %s131_s26 = smov [#allocation7]  }
   0x6   :  { %v36_v1 = vmul.f32 1.442695, %v35_v0  ;;  %v43_v6 = vsub.f32 %v40_v3, %v42_v5  ;;  %v44_v7 = vsub.f32 %v41_v4, %v42_v5  ;;  %s60_s27 = sshll.u32 %s131_s26, 4  ;;  %s62_s0 = sshll.u32 %s170_s3, 4  ;;  %s61_s27 = int_to_ptr.vmem [resolvable:$true] %s60_s27  ;;  %s63_s0 = int_to_ptr.hbm [resolvable:$true] %s62_s0 }
   0x7   :  { %v50_v11 = vstv %s33_s23 }
   0x8   :  { %76 = vpow2.f32 %v36_v1  ;;  %v45_v8 = vmul.f32 %v43_v6, %v43_v6  ;;  %v46_v9 = vmul.f32 %v44_v7, %v44_v7 }
   0xe   :  { %v77_v2 = vpop.eup %76 }
   0xf   :  { %72 = vpush %v77_v2 }
  0x40   :  { %s73_s24 = spop %72 }
  0x41   :  { %s39_s25 = smul.f32 0.5, %s73_s24 }
  0x43   :  { %v47_v10 = vstv %s39_s25 }
  0x44   :  { %v48_v12 = vmul.f32 %v47_v10, %v45_v8  ;;  %v49_v13 = vmul.f32 %v47_v10, %v46_v9 }
  0x46   :  { %v51_v14 = vsub.f32 %v50_v11, %v48_v12  ;;  %v52_v15 = vsub.f32 %v50_v11, %v49_v13 }
  0x48   :  { %53 = vst [vmem:[#allocation7] sm:$0xff] %v51_v14 }
  0x49   :  { %54 = vst [vmem:[#allocation7 + $0x8] sm:$0xff] %v52_v15 }
  0x4a   :  { %65 = dma.vmem_to_hbm [thread:$0]  %s61_s27, 256, %s63_s0, [#allocation6]  }
  0x4b   :  { %128 = dma.done.wait [#allocation6], 256  }
  0x4c   :  { %129 = vsyncadd [#allocation6], 4294967040 }
  0x4d   :  { %70 = vsyncpa [#allocation5], 1 }
  0x4e   :  { %71 = vsyncpa [#allocation6], 1 }

</bundles_post_ra>
